<compile_context>
chip_gen: v5e
topology: v5e:2x2
jax: 0.10.0
libtpu: 0.0.40
codegen_flags: <defaults>
</compile_context>

<pallas_src>
import functools

import jax
import jax.numpy as jnp
from jax import lax
from jax.experimental import pallas as pl
from jax.experimental.pallas import tpu as pltpu

EPS = 1e-5


def _focus_kernel(I, N, H, W, x_ref, p_ref, out_ref):
    G = N * W            # lanes per image group (32 at the shipped size)
    L = I * G            # total lanes (128 at the shipped size)
    inv_cnt = 1.0 / float(N * H * W)

    x = x_ref[...]       # [H, L]  lane-packed input, lane = img*G + n*W + w
    p = p_ref[...]       # [26, L] per-lane parameter tile (see wrapper for row layout)

    # ---- boundary / butterfly masks, built once, reused by both ConvBlocks ----
    lane = lax.broadcasted_iota(jnp.int32, (H, L), 1)
    w_pos = lane % W
    at_w0 = w_pos == 0              # no (w-1) neighbour inside the image -> zero padding
    at_wN = w_pos == W - 1          # no (w+1) neighbour
    row = lax.broadcasted_iota(jnp.int32, (H, L), 0)
    at_h0 = row == 0
    at_hN = row == H - 1

    lane1 = lax.broadcasted_iota(jnp.int32, (1, L), 1)
    bfly_lo = [((lane1 >> k) & 1) == 0 for k in range(G.bit_length() - 1)]

    def conv3x3(src, w9, bias):
        """3x3 SAME conv on the lane-packed [H, L] tile, all I images at once.

        w9: [9, L] per-lane (per-image) taps, row = dy*3 + dx; bias: [1, L].
        w-padding = lane roll + boundary select; h-padding = sublane roll + boundary
        select.  Everything stays in registers.
        """
        c_m1 = jnp.where(at_w0, 0.0, pltpu.roll(src, shift=1, axis=1))        # x[h, w-1]
        c_p1 = jnp.where(at_wN, 0.0, pltpu.roll(src, shift=L - 1, axis=1))    # x[h, w+1]
        # per-dy partial rows; bias folded into the un-shifted dy=1 row
        t0 = w9[0:1] * c_m1 + w9[1:2] * src + w9[2:3] * c_p1                  # needs row h-1
        t1 = bias + w9[3:4] * c_m1 + w9[4:5] * src + w9[5:6] * c_p1           # row h
        t2 = w9[6:7] * c_m1 + w9[7:8] * src + w9[8:9] * c_p1                  # needs row h+1
        r0 = jnp.where(at_h0, 0.0, pltpu.roll(t0, shift=1, axis=0))           # t0[h-1]
        r2 = jnp.where(at_hN, 0.0, pltpu.roll(t2, shift=H - 1, axis=0))       # t2[h+1]
        return r0 + t1 + r2

    def group_allreduce(v):
        """Sum v ([1, L]) within each aligned G-lane image group, broadcast to all lanes
        (XOR-partner butterfly via two lane rolls + one select per step; XLU work)."""
        for k, lo in enumerate(bfly_lo):
            s = 1 << k
            v = v + jnp.where(lo,
                              pltpu.roll(v, shift=L - s, axis=1),   # partner lane l + s
                              pltpu.roll(v, shift=s, axis=1))       # partner lane l - s
        return v

    def batchnorm(y, gamma, beta):
        """Training-mode BN per image (per 32-lane group), centered two-pass statistics."""
        mean = group_allreduce(jnp.sum(y, axis=0, keepdims=True)) * inv_cnt       # [1, L]
        d = y - mean
        var = group_allreduce(jnp.sum(d * d, axis=0, keepdims=True)) * inv_cnt    # [1, L]
        scale = gamma * lax.rsqrt(var + EPS)
        return d * scale + beta

    # ---- ConvBlock (conv -> ReLU -> BN -> conv -> ReLU -> BN), all I images at once ----
    y = jnp.maximum(conv3x3(x, p[0:9], p[9:10]), 0.0)
    y = batchnorm(y, p[10:11], p[11:12])
    y = jnp.maximum(conv3x3(y, p[12:21], p[21:22]), 0.0)
    y = batchnorm(y, p[22:23], p[23:24])

    # ---- FusionLayer: element-wise max across the I image groups (stride-G roll tree).
    # After log2(I) doubling steps every lane holds the max over its (n, w) position. ----
    fused = y
    s = G
    while s < L:
        fused = jnp.maximum(fused, pltpu.roll(fused, shift=s, axis=1))
        s *= 2

    # ---- final 1x1 conv (C == 1 -> scalar multiply-add), one fully lane-dense store ----
    out_ref[...] = p[24:25] * fused + p[25:26]


def _lane_broadcast(v, I, G):
    """[I, ...] per-image params -> [k, I*G]: each image's values repeated over its G lanes."""
    return jnp.repeat(jnp.asarray(v, jnp.float32).reshape(I, -1).T, G, axis=1)


def focus_stack_pallas(x_stack, params):
    """x_stack: [I, N, 1, H, W] float32 -> [N, 1, H, W] float32."""
    I, N, C, H, W = x_stack.shape
    assert C == 1, "FocusStackingNetwork default is num_channels=1"
    G = N * W
    L = I * G
    # lane packing / butterflies assume power-of-two group sizes; at the shipped size
    # I*N*W = 4*2*16 = 128 lanes, i.e. exactly one vreg of lanes.
    assert I & (I - 1) == 0 and G & (G - 1) == 0

    # lane-packed input [H, L], lane = img*G + n*W + w (wrapper-side layout plumbing only)
    xp = x_stack.reshape(I, N, H, W).transpose(2, 0, 1, 3).reshape(H, L)

    # parameter tile [26, L]: rows 0-8 w1 taps, 9 b1, 10 g1, 11 be1,
    #                         rows 12-20 w2 taps, 21 b2, 22 g2, 23 be2, 24 wf, 25 bf
    ptile = jnp.concatenate(
        [
            _lane_broadcast(params["w1"], I, G),
            _lane_broadcast(params["b1"], I, G),
            _lane_broadcast(params["g1"], I, G),
            _lane_broadcast(params["be1"], I, G),
            _lane_broadcast(params["w2"], I, G),
            _lane_broadcast(params["b2"], I, G),
            _lane_broadcast(params["g2"], I, G),
            _lane_broadcast(params["be2"], I, G),
            jnp.broadcast_to(params["wf"].reshape(1, 1), (1, L)),
            jnp.broadcast_to(params["bf"].reshape(1, 1), (1, L)),
        ],
        axis=0,
    ).astype(jnp.float32)

    vmem = pl.BlockSpec(memory_space=pltpu.MemorySpace.VMEM)
    out = pl.pallas_call(
        functools.partial(_focus_kernel, I, N, H, W),
        out_shape=jax.ShapeDtypeStruct((H, L), jnp.float32),
        in_specs=[vmem, vmem],
        out_specs=vmem,
    )(xp, ptile)

    # the fused value is replicated across all I image groups; take group 0, restore NCHW
    fused = out[:, :G].reshape(H, N, W)
    return jnp.transpose(fused, (1, 0, 2))[:, None, :, :]


# -------------------- pure-JAX reference (for verification) --------------------
def focus_stack_ref(x_stack, params):
    I = x_stack.shape[0]
    dn = ("NCHW", "OIHW", "NCHW")
    hp = jax.lax.Precision.HIGHEST
    outs = []
    for i in range(I):
        x = x_stack[i]
        w1 = params["w1"][i].reshape(1, 1, 3, 3)
        y = lax.conv_general_dilated(x, w1, (1, 1), "SAME", dimension_numbers=dn,
                                     precision=hp) + params["b1"][i]
        y = jnp.maximum(y, 0.0)
        m = jnp.mean(y); v = jnp.mean((y - m) ** 2)
        y = (y - m) * lax.rsqrt(v + EPS) * params["g1"][i] + params["be1"][i]
        w2 = params["w2"][i].reshape(1, 1, 3, 3)
        y = lax.conv_general_dilated(y, w2, (1, 1), "SAME", dimension_numbers=dn,
                                     precision=hp) + params["b2"][i]
        y = jnp.maximum(y, 0.0)
        m = jnp.mean(y); v = jnp.mean((y - m) ** 2)
        y = (y - m) * lax.rsqrt(v + EPS) * params["g2"][i] + params["be2"][i]
        outs.append(y)
    fused = jnp.max(jnp.stack(outs), axis=0)
    return params["wf"][0] * fused + params["bf"][0]


def init_params(key, I):
    ks = jax.random.split(key, 8)
    return dict(
        w1=(0.3 * jax.random.normal(ks[0], (I, 3, 3))).astype(jnp.float32),
        b1=(0.1 * jax.random.normal(ks[1], (I,))).astype(jnp.float32),
        g1=(1.0 + 0.1 * jax.random.normal(ks[2], (I,))).astype(jnp.float32),
        be1=(0.1 * jax.random.normal(ks[3], (I,))).astype(jnp.float32),
        w2=(0.3 * jax.random.normal(ks[4], (I, 3, 3))).astype(jnp.float32),
        b2=(0.1 * jax.random.normal(ks[5], (I,))).astype(jnp.float32),
        g2=(1.0 + 0.1 * jax.random.normal(ks[6], (I,))).astype(jnp.float32),
        be2=(0.1 * jax.random.normal(ks[7], (I,))).astype(jnp.float32),
        wf=jnp.array([0.7], jnp.float32),
        bf=jnp.array([0.05], jnp.float32),
    )


if __name__ == "__main__":
    I, N, C, H, W = 4, 2, 1, 16, 16              # num_input_images=4, num_channels=1
    key = jax.random.PRNGKey(0)
    kx, kp = jax.random.split(key)
    x_stack = jax.random.normal(kx, (I, N, C, H, W), dtype=jnp.float32)
    params = init_params(kp, I)

    out = jax.block_until_ready(focus_stack_pallas(x_stack, params))
    assert out.shape == (N, C, H, W)

    ref = focus_stack_ref(x_stack, params)
    err = float(jnp.max(jnp.abs(out - ref)))
    assert err < 1e-4, f"max abs err {err}"
    print("KERNEL_OK")
</pallas_src>

<mosaic_0001>
module attributes {stable_mosaic.version = 11 : i64} {
  func.func @_focus_kernel(%arg0: memref<16x128xf32, #tpu.memory_space<vmem>>, %arg1: memref<26x128xf32, #tpu.memory_space<vmem>>, %arg2: memref<16x128xf32, #tpu.memory_space<vmem>>) attributes {dimension_semantics = [], scalar_prefetch = 0 : i64, scratch_operands = 0 : i64, tpu.core_type = #tpu.core_type<tc>} {
    %c0 = arith.constant 0 : index
    %c0_0 = arith.constant 0 : index
    %0 = vector.load %arg0[%c0, %c0_0] : memref<16x128xf32, #tpu.memory_space<vmem>>, vector<16x128xf32>
    %c0_1 = arith.constant 0 : index
    %c0_2 = arith.constant 0 : index
    %1 = vector.load %arg1[%c0_1, %c0_2] : memref<26x128xf32, #tpu.memory_space<vmem>>, vector<26x128xf32>
    %2 = tpu.iota {dimensions = array<i32: 1>} : vector<16x128xi32>
    %c16_i32 = arith.constant 16 : i32
    %c0_i32 = arith.constant 0 : i32
    %3 = arith.cmpi eq, %c16_i32, %c0_i32 : i32
    %c1_i32 = arith.constant 1 : i32
    %4 = arith.select %3, %c1_i32, %c16_i32 : i32
    %5 = vector.broadcast %4 : i32 to vector<16x128xi32>
    %6 = arith.remsi %2, %5 : vector<16x128xi32>
    %c0_i32_3 = arith.constant 0 : i32
    %7 = vector.broadcast %c0_i32_3 : i32 to vector<16x128xi32>
    %8 = arith.cmpi ne, %6, %7 : vector<16x128xi32>
    %c0_i32_4 = arith.constant 0 : i32
    %9 = vector.broadcast %c0_i32_4 : i32 to vector<16x128xi32>
    %10 = arith.cmpi slt, %6, %9 : vector<16x128xi32>
    %c0_i32_5 = arith.constant 0 : i32
    %11 = arith.cmpi slt, %4, %c0_i32_5 : i32
    %12 = vector.broadcast %11 : i1 to vector<16x128xi1>
    %13 = vector.broadcast %12 : vector<16x128xi1> to vector<16x128xi1>
    %14 = arith.xori %10, %13 : vector<16x128xi1>
    %15 = arith.andi %14, %8 : vector<16x128xi1>
    %16 = vector.broadcast %4 : i32 to vector<16x128xi32>
    %17 = arith.addi %6, %16 : vector<16x128xi32>
    %18 = arith.select %15, %17, %6 : vector<16x128xi1>, vector<16x128xi32>
    %c0_i32_6 = arith.constant 0 : i32
    %19 = vector.broadcast %c0_i32_6 : i32 to vector<16x128xi32>
    %20 = arith.cmpi eq, %18, %19 : vector<16x128xi32>
    %c15_i32 = arith.constant 15 : i32
    %21 = vector.broadcast %c15_i32 : i32 to vector<16x128xi32>
    %22 = arith.cmpi eq, %18, %21 : vector<16x128xi32>
    %23 = tpu.iota {dimensions = array<i32: 0>} : vector<16x128xi32>
    %c0_i32_7 = arith.constant 0 : i32
    %24 = vector.broadcast %c0_i32_7 : i32 to vector<16x128xi32>
    %25 = arith.cmpi eq, %23, %24 : vector<16x128xi32>
    %c15_i32_8 = arith.constant 15 : i32
    %26 = vector.broadcast %c15_i32_8 : i32 to vector<16x128xi32>
    %27 = arith.cmpi eq, %23, %26 : vector<16x128xi32>
    %28 = tpu.iota {dimensions = array<i32: 1>} : vector<1x128xi32>
    %c0_i32_9 = arith.constant 0 : i32
    %29 = vector.broadcast %c0_i32_9 : i32 to vector<1x128xi32>
    %30 = arith.shrsi %28, %29 : vector<1x128xi32>
    %c1_i32_10 = arith.constant 1 : i32
    %31 = vector.broadcast %c1_i32_10 : i32 to vector<1x128xi32>
    %32 = arith.andi %30, %31 : vector<1x128xi32>
    %c0_i32_11 = arith.constant 0 : i32
    %33 = vector.broadcast %c0_i32_11 : i32 to vector<1x128xi32>
    %34 = arith.cmpi eq, %32, %33 : vector<1x128xi32>
    %c1_i32_12 = arith.constant 1 : i32
    %35 = vector.broadcast %c1_i32_12 : i32 to vector<1x128xi32>
    %36 = arith.shrsi %28, %35 : vector<1x128xi32>
    %c1_i32_13 = arith.constant 1 : i32
    %37 = vector.broadcast %c1_i32_13 : i32 to vector<1x128xi32>
    %38 = arith.andi %36, %37 : vector<1x128xi32>
    %c0_i32_14 = arith.constant 0 : i32
    %39 = vector.broadcast %c0_i32_14 : i32 to vector<1x128xi32>
    %40 = arith.cmpi eq, %38, %39 : vector<1x128xi32>
    %c2_i32 = arith.constant 2 : i32
    %41 = vector.broadcast %c2_i32 : i32 to vector<1x128xi32>
    %42 = arith.shrsi %28, %41 : vector<1x128xi32>
    %c1_i32_15 = arith.constant 1 : i32
    %43 = vector.broadcast %c1_i32_15 : i32 to vector<1x128xi32>
    %44 = arith.andi %42, %43 : vector<1x128xi32>
    %c0_i32_16 = arith.constant 0 : i32
    %45 = vector.broadcast %c0_i32_16 : i32 to vector<1x128xi32>
    %46 = arith.cmpi eq, %44, %45 : vector<1x128xi32>
    %c3_i32 = arith.constant 3 : i32
    %47 = vector.broadcast %c3_i32 : i32 to vector<1x128xi32>
    %48 = arith.shrsi %28, %47 : vector<1x128xi32>
    %c1_i32_17 = arith.constant 1 : i32
    %49 = vector.broadcast %c1_i32_17 : i32 to vector<1x128xi32>
    %50 = arith.andi %48, %49 : vector<1x128xi32>
    %c0_i32_18 = arith.constant 0 : i32
    %51 = vector.broadcast %c0_i32_18 : i32 to vector<1x128xi32>
    %52 = arith.cmpi eq, %50, %51 : vector<1x128xi32>
    %c4_i32 = arith.constant 4 : i32
    %53 = vector.broadcast %c4_i32 : i32 to vector<1x128xi32>
    %54 = arith.shrsi %28, %53 : vector<1x128xi32>
    %c1_i32_19 = arith.constant 1 : i32
    %55 = vector.broadcast %c1_i32_19 : i32 to vector<1x128xi32>
    %56 = arith.andi %54, %55 : vector<1x128xi32>
    %c0_i32_20 = arith.constant 0 : i32
    %57 = vector.broadcast %c0_i32_20 : i32 to vector<1x128xi32>
    %58 = arith.cmpi eq, %56, %57 : vector<1x128xi32>
    %59 = vector.extract_strided_slice %1 {offsets = [0, 0], sizes = [9, 128], strides = [1, 1]} : vector<26x128xf32> to vector<9x128xf32>
    %60 = vector.extract_strided_slice %1 {offsets = [9, 0], sizes = [1, 128], strides = [1, 1]} : vector<26x128xf32> to vector<1x128xf32>
    %c1_i32_21 = arith.constant 1 : i32
    %61 = tpu.dynamic_rotate %0 by %c1_i32_21 dim 1 : vector<16x128xf32>, i32 -> vector<16x128xf32>
    %cst = arith.constant 0.000000e+00 : f32
    %62 = vector.broadcast %cst : f32 to vector<16x128xf32>
    %63 = arith.select %20, %62, %61 : vector<16x128xi1>, vector<16x128xf32>
    %c127_i32 = arith.constant 127 : i32
    %64 = tpu.dynamic_rotate %0 by %c127_i32 dim 1 : vector<16x128xf32>, i32 -> vector<16x128xf32>
    %cst_22 = arith.constant 0.000000e+00 : f32
    %65 = vector.broadcast %cst_22 : f32 to vector<16x128xf32>
    %66 = arith.select %22, %65, %64 : vector<16x128xi1>, vector<16x128xf32>
    %67 = vector.extract_strided_slice %59 {offsets = [0, 0], sizes = [1, 128], strides = [1, 1]} : vector<9x128xf32> to vector<1x128xf32>
    %68 = vector.broadcast %67 : vector<1x128xf32> to vector<16x128xf32>
    %69 = arith.mulf %68, %63 : vector<16x128xf32>
    %70 = vector.extract_strided_slice %59 {offsets = [1, 0], sizes = [1, 128], strides = [1, 1]} : vector<9x128xf32> to vector<1x128xf32>
    %71 = vector.broadcast %70 : vector<1x128xf32> to vector<16x128xf32>
    %72 = arith.mulf %71, %0 : vector<16x128xf32>
    %73 = arith.addf %69, %72 : vector<16x128xf32>
    %74 = vector.extract_strided_slice %59 {offsets = [2, 0], sizes = [1, 128], strides = [1, 1]} : vector<9x128xf32> to vector<1x128xf32>
    %75 = vector.broadcast %74 : vector<1x128xf32> to vector<16x128xf32>
    %76 = arith.mulf %75, %66 : vector<16x128xf32>
    %77 = arith.addf %73, %76 : vector<16x128xf32>
    %78 = vector.extract_strided_slice %59 {offsets = [3, 0], sizes = [1, 128], strides = [1, 1]} : vector<9x128xf32> to vector<1x128xf32>
    %79 = vector.broadcast %78 : vector<1x128xf32> to vector<16x128xf32>
    %80 = arith.mulf %79, %63 : vector<16x128xf32>
    %81 = vector.broadcast %60 : vector<1x128xf32> to vector<16x128xf32>
    %82 = arith.addf %81, %80 : vector<16x128xf32>
    %83 = vector.extract_strided_slice %59 {offsets = [4, 0], sizes = [1, 128], strides = [1, 1]} : vector<9x128xf32> to vector<1x128xf32>
    %84 = vector.broadcast %83 : vector<1x128xf32> to vector<16x128xf32>
    %85 = arith.mulf %84, %0 : vector<16x128xf32>
    %86 = arith.addf %82, %85 : vector<16x128xf32>
    %87 = vector.extract_strided_slice %59 {offsets = [5, 0], sizes = [1, 128], strides = [1, 1]} : vector<9x128xf32> to vector<1x128xf32>
    %88 = vector.broadcast %87 : vector<1x128xf32> to vector<16x128xf32>
    %89 = arith.mulf %88, %66 : vector<16x128xf32>
    %90 = arith.addf %86, %89 : vector<16x128xf32>
    %91 = vector.extract_strided_slice %59 {offsets = [6, 0], sizes = [1, 128], strides = [1, 1]} : vector<9x128xf32> to vector<1x128xf32>
    %92 = vector.broadcast %91 : vector<1x128xf32> to vector<16x128xf32>
    %93 = arith.mulf %92, %63 : vector<16x128xf32>
    %94 = vector.extract_strided_slice %59 {offsets = [7, 0], sizes = [1, 128], strides = [1, 1]} : vector<9x128xf32> to vector<1x128xf32>
    %95 = vector.broadcast %94 : vector<1x128xf32> to vector<16x128xf32>
    %96 = arith.mulf %95, %0 : vector<16x128xf32>
    %97 = arith.addf %93, %96 : vector<16x128xf32>
    %98 = vector.extract_strided_slice %59 {offsets = [8, 0], sizes = [1, 128], strides = [1, 1]} : vector<9x128xf32> to vector<1x128xf32>
    %99 = vector.broadcast %98 : vector<1x128xf32> to vector<16x128xf32>
    %100 = arith.mulf %99, %66 : vector<16x128xf32>
    %101 = arith.addf %97, %100 : vector<16x128xf32>
    %c1_i32_23 = arith.constant 1 : i32
    %102 = tpu.dynamic_rotate %77 by %c1_i32_23 dim 0 : vector<16x128xf32>, i32 -> vector<16x128xf32>
    %cst_24 = arith.constant 0.000000e+00 : f32
    %103 = vector.broadcast %cst_24 : f32 to vector<16x128xf32>
    %104 = arith.select %25, %103, %102 : vector<16x128xi1>, vector<16x128xf32>
    %c15_i32_25 = arith.constant 15 : i32
    %105 = tpu.dynamic_rotate %101 by %c15_i32_25 dim 0 : vector<16x128xf32>, i32 -> vector<16x128xf32>
    %cst_26 = arith.constant 0.000000e+00 : f32
    %106 = vector.broadcast %cst_26 : f32 to vector<16x128xf32>
    %107 = arith.select %27, %106, %105 : vector<16x128xi1>, vector<16x128xf32>
    %108 = arith.addf %104, %90 : vector<16x128xf32>
    %109 = arith.addf %108, %107 : vector<16x128xf32>
    %cst_27 = arith.constant 0.000000e+00 : f32
    %110 = vector.broadcast %cst_27 : f32 to vector<16x128xf32>
    %111 = arith.maximumf %109, %110 : vector<16x128xf32>
    %112 = vector.extract_strided_slice %1 {offsets = [10, 0], sizes = [1, 128], strides = [1, 1]} : vector<26x128xf32> to vector<1x128xf32>
    %113 = vector.extract_strided_slice %1 {offsets = [11, 0], sizes = [1, 128], strides = [1, 1]} : vector<26x128xf32> to vector<1x128xf32>
    %cst_28 = arith.constant dense<0.000000e+00> : vector<128xf32>
    %114 = vector.multi_reduction <add>, %111, %cst_28 [0] : vector<16x128xf32> to vector<128xf32>
    %115 = vector.shape_cast %114 : vector<128xf32> to vector<1x128xf32>
    %c127_i32_29 = arith.constant 127 : i32
    %116 = tpu.dynamic_rotate %115 by %c127_i32_29 dim 1 : vector<1x128xf32>, i32 -> vector<1x128xf32>
    %c1_i32_30 = arith.constant 1 : i32
    %117 = tpu.dynamic_rotate %115 by %c1_i32_30 dim 1 : vector<1x128xf32>, i32 -> vector<1x128xf32>
    %118 = arith.select %34, %116, %117 : vector<1x128xi1>, vector<1x128xf32>
    %119 = arith.addf %115, %118 : vector<1x128xf32>
    %c126_i32 = arith.constant 126 : i32
    %120 = tpu.dynamic_rotate %119 by %c126_i32 dim 1 : vector<1x128xf32>, i32 -> vector<1x128xf32>
    %c2_i32_31 = arith.constant 2 : i32
    %121 = tpu.dynamic_rotate %119 by %c2_i32_31 dim 1 : vector<1x128xf32>, i32 -> vector<1x128xf32>
    %122 = arith.select %40, %120, %121 : vector<1x128xi1>, vector<1x128xf32>
    %123 = arith.addf %119, %122 : vector<1x128xf32>
    %c124_i32 = arith.constant 124 : i32
    %124 = tpu.dynamic_rotate %123 by %c124_i32 dim 1 : vector<1x128xf32>, i32 -> vector<1x128xf32>
    %c4_i32_32 = arith.constant 4 : i32
    %125 = tpu.dynamic_rotate %123 by %c4_i32_32 dim 1 : vector<1x128xf32>, i32 -> vector<1x128xf32>
    %126 = arith.select %46, %124, %125 : vector<1x128xi1>, vector<1x128xf32>
    %127 = arith.addf %123, %126 : vector<1x128xf32>
    %c120_i32 = arith.constant 120 : i32
    %128 = tpu.dynamic_rotate %127 by %c120_i32 dim 1 : vector<1x128xf32>, i32 -> vector<1x128xf32>
    %c8_i32 = arith.constant 8 : i32
    %129 = tpu.dynamic_rotate %127 by %c8_i32 dim 1 : vector<1x128xf32>, i32 -> vector<1x128xf32>
    %130 = arith.select %52, %128, %129 : vector<1x128xi1>, vector<1x128xf32>
    %131 = arith.addf %127, %130 : vector<1x128xf32>
    %c112_i32 = arith.constant 112 : i32
    %132 = tpu.dynamic_rotate %131 by %c112_i32 dim 1 : vector<1x128xf32>, i32 -> vector<1x128xf32>
    %c16_i32_33 = arith.constant 16 : i32
    %133 = tpu.dynamic_rotate %131 by %c16_i32_33 dim 1 : vector<1x128xf32>, i32 -> vector<1x128xf32>
    %134 = arith.select %58, %132, %133 : vector<1x128xi1>, vector<1x128xf32>
    %135 = arith.addf %131, %134 : vector<1x128xf32>
    %cst_34 = arith.constant 0.001953125 : f32
    %136 = vector.broadcast %cst_34 : f32 to vector<1x128xf32>
    %137 = arith.mulf %135, %136 : vector<1x128xf32>
    %138 = vector.broadcast %137 : vector<1x128xf32> to vector<16x128xf32>
    %139 = arith.subf %111, %138 : vector<16x128xf32>
    %140 = arith.mulf %139, %139 : vector<16x128xf32>
    %cst_35 = arith.constant dense<0.000000e+00> : vector<128xf32>
    %141 = vector.multi_reduction <add>, %140, %cst_35 [0] : vector<16x128xf32> to vector<128xf32>
    %142 = vector.shape_cast %141 : vector<128xf32> to vector<1x128xf32>
    %c127_i32_36 = arith.constant 127 : i32
    %143 = tpu.dynamic_rotate %142 by %c127_i32_36 dim 1 : vector<1x128xf32>, i32 -> vector<1x128xf32>
    %c1_i32_37 = arith.constant 1 : i32
    %144 = tpu.dynamic_rotate %142 by %c1_i32_37 dim 1 : vector<1x128xf32>, i32 -> vector<1x128xf32>
    %145 = arith.select %34, %143, %144 : vector<1x128xi1>, vector<1x128xf32>
    %146 = arith.addf %142, %145 : vector<1x128xf32>
    %c126_i32_38 = arith.constant 126 : i32
    %147 = tpu.dynamic_rotate %146 by %c126_i32_38 dim 1 : vector<1x128xf32>, i32 -> vector<1x128xf32>
    %c2_i32_39 = arith.constant 2 : i32
    %148 = tpu.dynamic_rotate %146 by %c2_i32_39 dim 1 : vector<1x128xf32>, i32 -> vector<1x128xf32>
    %149 = arith.select %40, %147, %148 : vector<1x128xi1>, vector<1x128xf32>
    %150 = arith.addf %146, %149 : vector<1x128xf32>
    %c124_i32_40 = arith.constant 124 : i32
    %151 = tpu.dynamic_rotate %150 by %c124_i32_40 dim 1 : vector<1x128xf32>, i32 -> vector<1x128xf32>
    %c4_i32_41 = arith.constant 4 : i32
    %152 = tpu.dynamic_rotate %150 by %c4_i32_41 dim 1 : vector<1x128xf32>, i32 -> vector<1x128xf32>
    %153 = arith.select %46, %151, %152 : vector<1x128xi1>, vector<1x128xf32>
    %154 = arith.addf %150, %153 : vector<1x128xf32>
    %c120_i32_42 = arith.constant 120 : i32
    %155 = tpu.dynamic_rotate %154 by %c120_i32_42 dim 1 : vector<1x128xf32>, i32 -> vector<1x128xf32>
    %c8_i32_43 = arith.constant 8 : i32
    %156 = tpu.dynamic_rotate %154 by %c8_i32_43 dim 1 : vector<1x128xf32>, i32 -> vector<1x128xf32>
    %157 = arith.select %52, %155, %156 : vector<1x128xi1>, vector<1x128xf32>
    %158 = arith.addf %154, %157 : vector<1x128xf32>
    %c112_i32_44 = arith.constant 112 : i32
    %159 = tpu.dynamic_rotate %158 by %c112_i32_44 dim 1 : vector<1x128xf32>, i32 -> vector<1x128xf32>
    %c16_i32_45 = arith.constant 16 : i32
    %160 = tpu.dynamic_rotate %158 by %c16_i32_45 dim 1 : vector<1x128xf32>, i32 -> vector<1x128xf32>
    %161 = arith.select %58, %159, %160 : vector<1x128xi1>, vector<1x128xf32>
    %162 = arith.addf %158, %161 : vector<1x128xf32>
    %cst_46 = arith.constant 0.001953125 : f32
    %163 = vector.broadcast %cst_46 : f32 to vector<1x128xf32>
    %164 = arith.mulf %162, %163 : vector<1x128xf32>
    %cst_47 = arith.constant 9.99999974E-6 : f32
    %165 = vector.broadcast %cst_47 : f32 to vector<1x128xf32>
    %166 = arith.addf %164, %165 : vector<1x128xf32>
    %167 = math.rsqrt %166 : vector<1x128xf32>
    %168 = arith.mulf %112, %167 : vector<1x128xf32>
    %169 = vector.broadcast %168 : vector<1x128xf32> to vector<16x128xf32>
    %170 = arith.mulf %139, %169 : vector<16x128xf32>
    %171 = vector.broadcast %113 : vector<1x128xf32> to vector<16x128xf32>
    %172 = arith.addf %170, %171 : vector<16x128xf32>
    %173 = vector.extract_strided_slice %1 {offsets = [12, 0], sizes = [9, 128], strides = [1, 1]} : vector<26x128xf32> to vector<9x128xf32>
    %174 = vector.extract_strided_slice %1 {offsets = [21, 0], sizes = [1, 128], strides = [1, 1]} : vector<26x128xf32> to vector<1x128xf32>
    %c1_i32_48 = arith.constant 1 : i32
    %175 = tpu.dynamic_rotate %172 by %c1_i32_48 dim 1 : vector<16x128xf32>, i32 -> vector<16x128xf32>
    %cst_49 = arith.constant 0.000000e+00 : f32
    %176 = vector.broadcast %cst_49 : f32 to vector<16x128xf32>
    %177 = arith.select %20, %176, %175 : vector<16x128xi1>, vector<16x128xf32>
    %c127_i32_50 = arith.constant 127 : i32
    %178 = tpu.dynamic_rotate %172 by %c127_i32_50 dim 1 : vector<16x128xf32>, i32 -> vector<16x128xf32>
    %cst_51 = arith.constant 0.000000e+00 : f32
    %179 = vector.broadcast %cst_51 : f32 to vector<16x128xf32>
    %180 = arith.select %22, %179, %178 : vector<16x128xi1>, vector<16x128xf32>
    %181 = vector.extract_strided_slice %173 {offsets = [0, 0], sizes = [1, 128], strides = [1, 1]} : vector<9x128xf32> to vector<1x128xf32>
    %182 = vector.broadcast %181 : vector<1x128xf32> to vector<16x128xf32>
    %183 = arith.mulf %182, %177 : vector<16x128xf32>
    %184 = vector.extract_strided_slice %173 {offsets = [1, 0], sizes = [1, 128], strides = [1, 1]} : vector<9x128xf32> to vector<1x128xf32>
    %185 = vector.broadcast %184 : vector<1x128xf32> to vector<16x128xf32>
    %186 = arith.mulf %185, %172 : vector<16x128xf32>
    %187 = arith.addf %183, %186 : vector<16x128xf32>
    %188 = vector.extract_strided_slice %173 {offsets = [2, 0], sizes = [1, 128], strides = [1, 1]} : vector<9x128xf32> to vector<1x128xf32>
    %189 = vector.broadcast %188 : vector<1x128xf32> to vector<16x128xf32>
    %190 = arith.mulf %189, %180 : vector<16x128xf32>
    %191 = arith.addf %187, %190 : vector<16x128xf32>
    %192 = vector.extract_strided_slice %173 {offsets = [3, 0], sizes = [1, 128], strides = [1, 1]} : vector<9x128xf32> to vector<1x128xf32>
    %193 = vector.broadcast %192 : vector<1x128xf32> to vector<16x128xf32>
    %194 = arith.mulf %193, %177 : vector<16x128xf32>
    %195 = vector.broadcast %174 : vector<1x128xf32> to vector<16x128xf32>
    %196 = arith.addf %195, %194 : vector<16x128xf32>
    %197 = vector.extract_strided_slice %173 {offsets = [4, 0], sizes = [1, 128], strides = [1, 1]} : vector<9x128xf32> to vector<1x128xf32>
    %198 = vector.broadcast %197 : vector<1x128xf32> to vector<16x128xf32>
    %199 = arith.mulf %198, %172 : vector<16x128xf32>
    %200 = arith.addf %196, %199 : vector<16x128xf32>
    %201 = vector.extract_strided_slice %173 {offsets = [5, 0], sizes = [1, 128], strides = [1, 1]} : vector<9x128xf32> to vector<1x128xf32>
    %202 = vector.broadcast %201 : vector<1x128xf32> to vector<16x128xf32>
    %203 = arith.mulf %202, %180 : vector<16x128xf32>
    %204 = arith.addf %200, %203 : vector<16x128xf32>
    %205 = vector.extract_strided_slice %173 {offsets = [6, 0], sizes = [1, 128], strides = [1, 1]} : vector<9x128xf32> to vector<1x128xf32>
    %206 = vector.broadcast %205 : vector<1x128xf32> to vector<16x128xf32>
    %207 = arith.mulf %206, %177 : vector<16x128xf32>
    %208 = vector.extract_strided_slice %173 {offsets = [7, 0], sizes = [1, 128], strides = [1, 1]} : vector<9x128xf32> to vector<1x128xf32>
    %209 = vector.broadcast %208 : vector<1x128xf32> to vector<16x128xf32>
    %210 = arith.mulf %209, %172 : vector<16x128xf32>
    %211 = arith.addf %207, %210 : vector<16x128xf32>
    %212 = vector.extract_strided_slice %173 {offsets = [8, 0], sizes = [1, 128], strides = [1, 1]} : vector<9x128xf32> to vector<1x128xf32>
    %213 = vector.broadcast %212 : vector<1x128xf32> to vector<16x128xf32>
    %214 = arith.mulf %213, %180 : vector<16x128xf32>
    %215 = arith.addf %211, %214 : vector<16x128xf32>
    %c1_i32_52 = arith.constant 1 : i32
    %216 = tpu.dynamic_rotate %191 by %c1_i32_52 dim 0 : vector<16x128xf32>, i32 -> vector<16x128xf32>
    %cst_53 = arith.constant 0.000000e+00 : f32
    %217 = vector.broadcast %cst_53 : f32 to vector<16x128xf32>
    %218 = arith.select %25, %217, %216 : vector<16x128xi1>, vector<16x128xf32>
    %c15_i32_54 = arith.constant 15 : i32
    %219 = tpu.dynamic_rotate %215 by %c15_i32_54 dim 0 : vector<16x128xf32>, i32 -> vector<16x128xf32>
    %cst_55 = arith.constant 0.000000e+00 : f32
    %220 = vector.broadcast %cst_55 : f32 to vector<16x128xf32>
    %221 = arith.select %27, %220, %219 : vector<16x128xi1>, vector<16x128xf32>
    %222 = arith.addf %218, %204 : vector<16x128xf32>
    %223 = arith.addf %222, %221 : vector<16x128xf32>
    %cst_56 = arith.constant 0.000000e+00 : f32
    %224 = vector.broadcast %cst_56 : f32 to vector<16x128xf32>
    %225 = arith.maximumf %223, %224 : vector<16x128xf32>
    %226 = vector.extract_strided_slice %1 {offsets = [22, 0], sizes = [1, 128], strides = [1, 1]} : vector<26x128xf32> to vector<1x128xf32>
    %227 = vector.extract_strided_slice %1 {offsets = [23, 0], sizes = [1, 128], strides = [1, 1]} : vector<26x128xf32> to vector<1x128xf32>
    %cst_57 = arith.constant dense<0.000000e+00> : vector<128xf32>
    %228 = vector.multi_reduction <add>, %225, %cst_57 [0] : vector<16x128xf32> to vector<128xf32>
    %229 = vector.shape_cast %228 : vector<128xf32> to vector<1x128xf32>
    %c127_i32_58 = arith.constant 127 : i32
    %230 = tpu.dynamic_rotate %229 by %c127_i32_58 dim 1 : vector<1x128xf32>, i32 -> vector<1x128xf32>
    %c1_i32_59 = arith.constant 1 : i32
    %231 = tpu.dynamic_rotate %229 by %c1_i32_59 dim 1 : vector<1x128xf32>, i32 -> vector<1x128xf32>
    %232 = arith.select %34, %230, %231 : vector<1x128xi1>, vector<1x128xf32>
    %233 = arith.addf %229, %232 : vector<1x128xf32>
    %c126_i32_60 = arith.constant 126 : i32
    %234 = tpu.dynamic_rotate %233 by %c126_i32_60 dim 1 : vector<1x128xf32>, i32 -> vector<1x128xf32>
    %c2_i32_61 = arith.constant 2 : i32
    %235 = tpu.dynamic_rotate %233 by %c2_i32_61 dim 1 : vector<1x128xf32>, i32 -> vector<1x128xf32>
    %236 = arith.select %40, %234, %235 : vector<1x128xi1>, vector<1x128xf32>
    %237 = arith.addf %233, %236 : vector<1x128xf32>
    %c124_i32_62 = arith.constant 124 : i32
    %238 = tpu.dynamic_rotate %237 by %c124_i32_62 dim 1 : vector<1x128xf32>, i32 -> vector<1x128xf32>
    %c4_i32_63 = arith.constant 4 : i32
    %239 = tpu.dynamic_rotate %237 by %c4_i32_63 dim 1 : vector<1x128xf32>, i32 -> vector<1x128xf32>
    %240 = arith.select %46, %238, %239 : vector<1x128xi1>, vector<1x128xf32>
    %241 = arith.addf %237, %240 : vector<1x128xf32>
    %c120_i32_64 = arith.constant 120 : i32
    %242 = tpu.dynamic_rotate %241 by %c120_i32_64 dim 1 : vector<1x128xf32>, i32 -> vector<1x128xf32>
    %c8_i32_65 = arith.constant 8 : i32
    %243 = tpu.dynamic_rotate %241 by %c8_i32_65 dim 1 : vector<1x128xf32>, i32 -> vector<1x128xf32>
    %244 = arith.select %52, %242, %243 : vector<1x128xi1>, vector<1x128xf32>
    %245 = arith.addf %241, %244 : vector<1x128xf32>
    %c112_i32_66 = arith.constant 112 : i32
    %246 = tpu.dynamic_rotate %245 by %c112_i32_66 dim 1 : vector<1x128xf32>, i32 -> vector<1x128xf32>
    %c16_i32_67 = arith.constant 16 : i32
    %247 = tpu.dynamic_rotate %245 by %c16_i32_67 dim 1 : vector<1x128xf32>, i32 -> vector<1x128xf32>
    %248 = arith.select %58, %246, %247 : vector<1x128xi1>, vector<1x128xf32>
    %249 = arith.addf %245, %248 : vector<1x128xf32>
    %cst_68 = arith.constant 0.001953125 : f32
    %250 = vector.broadcast %cst_68 : f32 to vector<1x128xf32>
    %251 = arith.mulf %249, %250 : vector<1x128xf32>
    %252 = vector.broadcast %251 : vector<1x128xf32> to vector<16x128xf32>
    %253 = arith.subf %225, %252 : vector<16x128xf32>
    %254 = arith.mulf %253, %253 : vector<16x128xf32>
    %cst_69 = arith.constant dense<0.000000e+00> : vector<128xf32>
    %255 = vector.multi_reduction <add>, %254, %cst_69 [0] : vector<16x128xf32> to vector<128xf32>
    %256 = vector.shape_cast %255 : vector<128xf32> to vector<1x128xf32>
    %c127_i32_70 = arith.constant 127 : i32
    %257 = tpu.dynamic_rotate %256 by %c127_i32_70 dim 1 : vector<1x128xf32>, i32 -> vector<1x128xf32>
    %c1_i32_71 = arith.constant 1 : i32
    %258 = tpu.dynamic_rotate %256 by %c1_i32_71 dim 1 : vector<1x128xf32>, i32 -> vector<1x128xf32>
    %259 = arith.select %34, %257, %258 : vector<1x128xi1>, vector<1x128xf32>
    %260 = arith.addf %256, %259 : vector<1x128xf32>
    %c126_i32_72 = arith.constant 126 : i32
    %261 = tpu.dynamic_rotate %260 by %c126_i32_72 dim 1 : vector<1x128xf32>, i32 -> vector<1x128xf32>
    %c2_i32_73 = arith.constant 2 : i32
    %262 = tpu.dynamic_rotate %260 by %c2_i32_73 dim 1 : vector<1x128xf32>, i32 -> vector<1x128xf32>
    %263 = arith.select %40, %261, %262 : vector<1x128xi1>, vector<1x128xf32>
    %264 = arith.addf %260, %263 : vector<1x128xf32>
    %c124_i32_74 = arith.constant 124 : i32
    %265 = tpu.dynamic_rotate %264 by %c124_i32_74 dim 1 : vector<1x128xf32>, i32 -> vector<1x128xf32>
    %c4_i32_75 = arith.constant 4 : i32
    %266 = tpu.dynamic_rotate %264 by %c4_i32_75 dim 1 : vector<1x128xf32>, i32 -> vector<1x128xf32>
    %267 = arith.select %46, %265, %266 : vector<1x128xi1>, vector<1x128xf32>
    %268 = arith.addf %264, %267 : vector<1x128xf32>
    %c120_i32_76 = arith.constant 120 : i32
    %269 = tpu.dynamic_rotate %268 by %c120_i32_76 dim 1 : vector<1x128xf32>, i32 -> vector<1x128xf32>
    %c8_i32_77 = arith.constant 8 : i32
    %270 = tpu.dynamic_rotate %268 by %c8_i32_77 dim 1 : vector<1x128xf32>, i32 -> vector<1x128xf32>
    %271 = arith.select %52, %269, %270 : vector<1x128xi1>, vector<1x128xf32>
    %272 = arith.addf %268, %271 : vector<1x128xf32>
    %c112_i32_78 = arith.constant 112 : i32
    %273 = tpu.dynamic_rotate %272 by %c112_i32_78 dim 1 : vector<1x128xf32>, i32 -> vector<1x128xf32>
    %c16_i32_79 = arith.constant 16 : i32
    %274 = tpu.dynamic_rotate %272 by %c16_i32_79 dim 1 : vector<1x128xf32>, i32 -> vector<1x128xf32>
    %275 = arith.select %58, %273, %274 : vector<1x128xi1>, vector<1x128xf32>
    %276 = arith.addf %272, %275 : vector<1x128xf32>
    %cst_80 = arith.constant 0.001953125 : f32
    %277 = vector.broadcast %cst_80 : f32 to vector<1x128xf32>
    %278 = arith.mulf %276, %277 : vector<1x128xf32>
    %cst_81 = arith.constant 9.99999974E-6 : f32
    %279 = vector.broadcast %cst_81 : f32 to vector<1x128xf32>
    %280 = arith.addf %278, %279 : vector<1x128xf32>
    %281 = math.rsqrt %280 : vector<1x128xf32>
    %282 = arith.mulf %226, %281 : vector<1x128xf32>
    %283 = vector.broadcast %282 : vector<1x128xf32> to vector<16x128xf32>
    %284 = arith.mulf %253, %283 : vector<16x128xf32>
    %285 = vector.broadcast %227 : vector<1x128xf32> to vector<16x128xf32>
    %286 = arith.addf %284, %285 : vector<16x128xf32>
    %c32_i32 = arith.constant 32 : i32
    %287 = tpu.dynamic_rotate %286 by %c32_i32 dim 1 : vector<16x128xf32>, i32 -> vector<16x128xf32>
    %288 = arith.maximumf %286, %287 : vector<16x128xf32>
    %c64_i32 = arith.constant 64 : i32
    %289 = tpu.dynamic_rotate %288 by %c64_i32 dim 1 : vector<16x128xf32>, i32 -> vector<16x128xf32>
    %290 = arith.maximumf %288, %289 : vector<16x128xf32>
    %291 = vector.extract_strided_slice %1 {offsets = [24, 0], sizes = [1, 128], strides = [1, 1]} : vector<26x128xf32> to vector<1x128xf32>
    %292 = vector.broadcast %291 : vector<1x128xf32> to vector<16x128xf32>
    %293 = arith.mulf %292, %290 : vector<16x128xf32>
    %294 = vector.extract_strided_slice %1 {offsets = [25, 0], sizes = [1, 128], strides = [1, 1]} : vector<26x128xf32> to vector<1x128xf32>
    %295 = vector.broadcast %294 : vector<1x128xf32> to vector<16x128xf32>
    %296 = arith.addf %293, %295 : vector<16x128xf32>
    %c0_82 = arith.constant 0 : index
    %c0_83 = arith.constant 0 : index
    %297 = vector.load %arg2[%c0_82, %c0_83] : memref<16x128xf32, #tpu.memory_space<vmem>>, vector<16x128xf32>
    tpu.vector_store %arg2[%c0_82, %c0_83], %296 {strides = array<i32>} : memref<16x128xf32, #tpu.memory_space<vmem>>, vector<16x128xf32>,
    return
  }
}

</mosaic_0001>

<bundles_post_ra>
// kernel: tpu_custom_call.1
= control target key start
LH: loop header
LB: loop body
LE: loop exit
PB: predicated region body
PF: predicated region fallthrough
CT: control target
= control target key end

     0   :  { %7 = vsyncpa [#allocation3], 0  ;;  %s823_s0 = inlined_call_operand.hbm [shape: f32[16,128], index: 0, kind: input, shape index: {}]   ;;  %s824_s1 = inlined_call_operand.hbm [shape: f32[26,128], index: 1, kind: input, shape index: {}]   ;;  %s825_s2 = inlined_call_operand.hbm [shape: f32[16,128], index: 2, kind: output, shape index: {}]  }
   0x1   :  { %8 = vsyncpa [#allocation6], 0 }
   0x2   :  { %9 = vsyncpa [#allocation4], 0  ;;  %s14_s11 = sshll.u32 %s823_s0, 4  ;;  %s575_s12 = smov [#allocation2]   ;;  %s15_s11 = int_to_ptr.hbm [resolvable:$true] %s14_s11 }
   0x3   :  { %s16_s13 = sshll.u32 %s575_s12, 4  ;;  %s27_s16 = sshll.u32 %s824_s1, 4  ;;  %s17_s13 = int_to_ptr.vmem [resolvable:$true] %s16_s13  ;;  %s28_s16 = int_to_ptr.hbm [resolvable:$true] %s27_s16 }
   0x4   :  { %s576_s17 = smov 128   ;;  %s577_s18 = smov 8  }
   0x5   :  { %22 = dma.hbm_to_vmem [thread:$0]  %s15_s11, 256, %s17_s13, [#allocation3], %s576_s17, %s576_s17, %s577_s18  }
   0x6   :  { %s578_s19 = smov [#allocation5]  }
   0x7   :  { %s29_s20 = sshll.u32 %s578_s19, 4  ;;  %s30_s20 = int_to_ptr.vmem [resolvable:$true] %s29_s20 }
   0x8   :  { %35 = dma.hbm_to_vmem [thread:$0]  %s28_s16, 512, %s30_s20, [#allocation6], %s576_s17, %s576_s17, %s577_s18  }
   0x9   :  { %569 = dma.done.wait [#allocation3], 256  }
   0xa   :  { %570 = vsyncadd [#allocation3], 4294967040 }
   0xb   :  { %571 = dma.done.wait [#allocation6], 512  }
   0xc   :  { %572 = vsyncadd [#allocation6], 4294966784  ;;  %v44_v0 = vld [vmem:[#allocation2] sm:$0xff]  ;;  %s579_s0 = smov 1   ;;  %s580_s1 = smov 127   ;;  %v45_v1 = vld [vmem:[#allocation2 + $0x8] sm:$0xff]  ;;  %v50_v2 = vlaneseq }
   0xd   :  { %87 = vrot.lane.b32.xlu0 %v44_v0, %s579_s0  ;;  %93 = vrot.lane.b32.xlu1 %v44_v0, %s580_s1  ;;  %v46_v5 = vld [vmem:[#allocation5] sm:$0xff]  ;;  %v629_v13 = vld [vmem:[#allocation5 + $0x8] sm:$0xff]  ;;  %s581_s21 = smov 2   ;;  %s582_s22 = smov 126  }
   0xe   :  { %v622_v3 = vand.u32 127, %v50_v2  ;;  %v99_v7 = vperm.slane %v46_v5, 0  ;;  %v102_v8 = vperm.slane %v46_v5, 1  ;;  %v128_v9 = vperm.slane %v46_v5, 6  ;;  %s583_s23 = smov 4   ;;  %s584_s24 = smov 124  }
   0xf   :  { %v131_v10 = vperm.slane %v46_v5, 7  ;;  %v112_v14 = vperm.slane %v46_v5, 3  ;;  %v107_v19 = vperm.slane %v46_v5, 2  ;;  %v118_v20 = vperm.slane %v46_v5, 4  ;;  %s585_s25 = smov 120   ;;  %s586_s26 = smov 16  }
  0x10   :  { %v56_v4 = vand.u32 15, %v622_v3  ;;  %v103_v18 = vmul.f32 %v102_v8, %v44_v0  ;;  %v136_v23 = vperm.slane %v629_v13, 0  ;;  %v115_v25 = vperm.slane %v629_v13, 1  ;;  %s587_s27 = smov 112   ;;  %s588_s28 = smov 32  }
  0x11   :  { %v132_v22 = vmul.f32 %v131_v10, %v44_v0  ;;  %v119_v29 = vmul.f32 %v118_v20, %v44_v0  ;;  %v641_v30 = vshrl.u32 %v50_v2, 7  ;;  %v104_v33 = vmul.f32 %v102_v8, %v45_v1  ;;  %s589_s29 = smov 64   ;;  %s590_s30 = smov [#allocation7]  }
  0x12   :  { %vm625_vm0 = vcmp.eq.s32.totalorder %v56_v4, 0  ;;  %vm633_vm1 = vcmp.eq.s32.totalorder %v56_v4, 15  ;;  %v133_v34 = vmul.f32 %v131_v10, %v45_v1  ;;  %v120_v39 = vmul.f32 %v118_v20, %v45_v1  ;;  %s461_s3 = sshll.u32 %s590_s30, 4  ;;  %s463_s6 = sshll.u32 %s825_s2, 4  ;;  %s462_s3 = int_to_ptr.vmem [resolvable:$true] %s461_s3  ;;  %s464_s6 = int_to_ptr.hbm [resolvable:$true] %s463_s6 }
  0x13   :  { %v123_v45 = vperm.slane %v46_v5, 5  ;;  %v648_v47 = vadd.s32 8, %v641_v30  ;;  %vm69_vm2 = vcmp.eq.s32.totalorder %v641_v30, 0  ;;  %vm143_vm3 = vcmp.lt.s32.totalorder %v641_v30, 1 }
  0x14   :  { %vm150_vm5 = vcmp.lt.s32.totalorder %v641_v30, 7 }
  0x15   :  { %89 = vrot.lane.b32.xlu0 %v45_v1, %s579_s0  ;;  %95 = vrot.lane.b32.xlu1 %v45_v1, %s580_s1  ;;  %vm72_vm4 = vcmp.eq.s32.totalorder %v648_v47, 15 }
  0x7f   :  { %v88_v11 = vpop.permute.xlu0 %87  ;;  %v94_v12 = vpop.permute.xlu1 %93 }
  0x80   :  { %v91_v15 = vsel %vm625_vm0, 0.0, %v88_v11  ;;  %v97_v24 = vsel %vm633_vm1, 0.0, %v94_v12 }
  0x81   :  { %v100_v17 = vmul.f32 %v99_v7, %v91_v15  ;;  %v129_v21 = vmul.f32 %v128_v9, %v91_v15  ;;  %v113_v26 = vmul.f32 %v112_v14, %v91_v15  ;;  %v108_v28 = vmul.f32 %v107_v19, %v97_v24 }
  0x82   :  { %v137_v32 = vmul.f32 %v136_v23, %v97_v24  ;;  %v124_v58 = vmul.f32 %v123_v45, %v97_v24 }
  0x83   :  { %v105_v27 = vadd.f32 %v103_v18, %v100_v17  ;;  %v134_v31 = vadd.f32 %v132_v22, %v129_v21  ;;  %v116_v37 = vadd.f32 %v115_v25, %v113_v26 }
  0x85   :  { %v110_v46 = vadd.f32 %v108_v28, %v105_v27  ;;  %v139_v49 = vadd.f32 %v137_v32, %v134_v31  ;;  %v121_v53 = vadd.f32 %v119_v29, %v116_v37  ;;  %v75_v31 = vshra.s32 %v622_v3, 1 }
  0x86   :  { %v78_v37 = vshra.s32 %v622_v3, 2 }
  0x87   :  { %v90_v35 = vpop.permute.xlu0 %89  ;;  %v96_v36 = vpop.permute.xlu1 %95  ;;  %v141_v59 = vrot.slane %v110_v46, 7  ;;  %v148_v60 = vrot.slane %v139_v49, 1  ;;  %v126_v0 = vadd.f32 %v124_v58, %v121_v53  ;;  %v686_v32 = vand.u32 1, %v75_v31 }
  0x88   :  { %v92_v38 = vsel %vm625_vm0, 0.0, %v90_v35  ;;  %v98_v40 = vsel %vm633_vm1, 0.0, %v96_v36 }
  0x89   :  { %v101_v41 = vmul.f32 %v99_v7, %v92_v38  ;;  %v114_v42 = vmul.f32 %v112_v14, %v92_v38  ;;  %v130_v43 = vmul.f32 %v128_v9, %v92_v38  ;;  %v109_v44 = vmul.f32 %v107_v19, %v98_v40 }
  0x8a   :  { %v138_v48 = vmul.f32 %v136_v23, %v98_v40  ;;  %v125_v56 = vmul.f32 %v123_v45, %v98_v40  ;;  %vm77_vm7 = vcmp.eq.s32.totalorder %v686_v32, 0  ;;  %v694_v38 = vand.u32 1, %v78_v37 }
  0x8b   :  { %v106_v50 = vadd.f32 %v104_v33, %v101_v41  ;;  %v117_v51 = vadd.f32 %v115_v25, %v114_v42  ;;  %v135_v52 = vadd.f32 %v133_v34, %v130_v43  ;;  %v73_v25 = vand.u32 1, %v622_v3 }
  0x8c   :  { %vm80_vm8 = vcmp.eq.s32.totalorder %v694_v38, 0  ;;  %v81_v43 = vshra.s32 %v622_v3, 3 }
  0x8d   :  { %v111_v54 = vadd.f32 %v109_v44, %v106_v50  ;;  %v122_v55 = vadd.f32 %v120_v39, %v117_v51  ;;  %v140_v57 = vadd.f32 %v138_v48, %v135_v52  ;;  %vm677_vm6 = vcmp.eq.s32.totalorder %v73_v25, 0 }
  0x8e   :  { %v702_v44 = vand.u32 1, %v81_v43  ;;  %v84_v50 = vshra.s32 %v622_v3, 4 }
  0x8f   :  { %v127_v61 = vadd.f32 %v125_v56, %v122_v55  ;;  %v142_v62 = vrot.slane %v111_v54, 7  ;;  %v149_v63 = vrot.slane %v140_v57, 1 }
  0x90   :  { %vm83_vm9 = vcmp.eq.s32.totalorder %v702_v44, 0  ;;  %v710_v51 = vand.u32 1, %v84_v50 }
  0x91   :  { %v144_v1 = vsel %vm143_vm3, %v141_v59, %v142_v62  ;;  %v145_v2 = vsel %vm143_vm3, %v142_v62, %v141_v59  ;;  %v152_v4 = vsel %vm150_vm5, %v149_v63, %v148_v60  ;;  %v151_v10 = vsel %vm150_vm5, %v148_v60, %v149_v63 }
  0x92   :  { %v146_v5 = vsel %vm69_vm2, 0.0, %v145_v2  ;;  %v154_v7 = vsel %vm72_vm4, 0.0, %v152_v4  ;;  %v156_v8 = vadd.f32 %v144_v1, %v127_v61  ;;  %vm86_vm10 = vcmp.eq.s32.totalorder %v710_v51, 0 }
  0x93   :  { %v155_v9 = vadd.f32 %v146_v5, %v126_v0 }
  0x94   :  { %v666_v11 = vadd.f32 %v156_v8, %v154_v7 }
  0x95   :  { %v668_v12 = vadd.f32 %v155_v9, %v151_v10 }
  0x96   :  { %v160_v14 = vmax.f32 %v666_v11, 0.0 }
  0x97   :  { %v159_v15 = vmax.f32 %v668_v12, 0.0 }
  0x99   :  { %v161_v17 = vadd.f32 %v160_v14, %v159_v15 }
  0x9b   :  { %v162_v18 = vrot.slane %v161_v17, 4 }
  0x9d   :  { %v163_v19 = vadd.f32 %v162_v18, %v161_v17 }
  0x9f   :  { %v164_v20 = vrot.slane %v163_v19, 2 }
  0xa1   :  { %v165_v21 = vadd.f32 %v164_v20, %v163_v19 }
  0xa3   :  { %v166_v22 = vrot.slane %v165_v21, 1 }
  0xa5   :  { %v167_v23 = vadd.f32 %v166_v22, %v165_v21 }
  0xa7   :  { %168 = vrot.lane.b32.xlu2 %v167_v23, %s580_s1 }
  0xaf   :  { %170 = vrot.lane.b32.xlu2 %v167_v23, %s579_s0 }
 0x101   :  { %v169_v24 = vpop.permute.xlu2 %168 }
 0x109   :  { %v171_v27 = vpop.permute.xlu2 %170 }
 0x10a   :  { %v172_v28 = vsel %vm677_vm6, %v169_v24, %v171_v27 }
 0x10b   :  { %v173_v29 = vadd.f32 %v172_v28, %v167_v23 }
 0x10d   :  { %176 = vrot.lane.b32.xlu1 %v173_v29, %s581_s21  ;;  %174 = vrot.lane.b32.xlu0 %v173_v29, %s582_s22 }
 0x17f   :  { %v177_v33 = vpop.permute.xlu1 %176  ;;  %v175_v34 = vpop.permute.xlu0 %174 }
 0x180   :  { %v178_v35 = vsel %vm77_vm7, %v175_v34, %v177_v33 }
 0x181   :  { %v179_v36 = vadd.f32 %v178_v35, %v173_v29 }
 0x183   :  { %182 = vrot.lane.b32.xlu0 %v179_v36, %s583_s23  ;;  %180 = vrot.lane.b32.xlu2 %v179_v36, %s584_s24 }
 0x1dd   :  { %v181_v39 = vpop.permute.xlu2 %180 }
 0x1f5   :  { %v183_v40 = vpop.permute.xlu0 %182 }
 0x1f6   :  { %v184_v41 = vsel %vm80_vm8, %v181_v39, %v183_v40 }
 0x1f7   :  { %v185_v42 = vadd.f32 %v184_v41, %v179_v36 }
 0x1f9   :  { %188 = vrot.lane.b32.xlu2 %v185_v42, %s577_s18  ;;  %186 = vrot.lane.b32.xlu1 %v185_v42, %s585_s25 }
 0x253   :  { %v189_v45 = vpop.permute.xlu2 %188 }
 0x26b   :  { %v187_v46 = vpop.permute.xlu1 %186 }
 0x26c   :  { %v190_v48 = vsel %vm83_vm9, %v187_v46, %v189_v45  ;;  %v260_v45 = vperm.slane %v629_v13, 3 }
 0x26d   :  { %v191_v49 = vadd.f32 %v190_v48, %v185_v42 }
 0x26f   :  { %194 = vrot.lane.b32.xlu1 %v191_v49, %s586_s26  ;;  %192 = vrot.lane.b32.xlu0 %v191_v49, %s587_s27 }
 0x2e1   :  { %v195_v52 = vpop.permute.xlu1 %194  ;;  %v193_v53 = vpop.permute.xlu0 %192 }
 0x2e2   :  { %v196_v54 = vsel %vm86_vm10, %v193_v53, %v195_v52  ;;  %v743_v52 = vld [vmem:[#allocation5 + $0x10] sm:$0xff]  ;;  %v275_v53 = vperm.slane %v629_v13, 4 }
 0x2e3   :  { %v197_v55 = vadd.f32 %v196_v54, %v191_v49  ;;  %v304_v54 = vperm.slane %v743_v52, 2  ;;  %v434_v51 = vperm.slane %v743_v52, 7 }
 0x2e5   :  { %v198_v56 = vmul.f32 0.001953125, %v197_v55  ;;  %v288_v55 = vperm.slane %v629_v13, 7 }
 0x2e7   :  { %v199_v57 = vperm.slane %v198_v56, 0 }
 0x2e9   :  { %v200_v58 = vsub.f32 %v159_v15, %v199_v57  ;;  %v201_v59 = vsub.f32 %v160_v14, %v199_v57  ;;  %v278_v57 = vperm.slane %v629_v13, 5 }
 0x2eb   :  { %v202_v60 = vmul.f32 %v200_v58, %v200_v58  ;;  %v203_v61 = vmul.f32 %v201_v59, %v201_v59 }
 0x2ed   :  { %v204_v62 = vadd.f32 %v203_v61, %v202_v60 }
 0x2ef   :  { %v205_v3 = vrot.slane %v204_v62, 4 }
 0x2f1   :  { %v206_v63 = vadd.f32 %v205_v3, %v204_v62 }
 0x2f3   :  { %v207_v0 = vrot.slane %v206_v63, 2 }
 0x2f5   :  { %v208_v1 = vadd.f32 %v207_v0, %v206_v63  ;;  %v291_v0 = vperm.slane %v743_v52, 5 }
 0x2f7   :  { %v209_v2 = vrot.slane %v208_v1, 1 }
 0x2f9   :  { %v210_v4 = vadd.f32 %v209_v2, %v208_v1  ;;  %v294_v1 = vperm.slane %v743_v52, 0 }
 0x2fb   :  { %213 = vrot.lane.b32.xlu0 %v210_v4, %s579_s0  ;;  %211 = vrot.lane.b32.xlu2 %v210_v4, %s580_s1 }
 0x355   :  { %v212_v5 = vpop.permute.xlu2 %211 }
 0x36d   :  { %v214_v7 = vpop.permute.xlu0 %213 }
 0x36e   :  { %v215_v8 = vsel %vm677_vm6, %v212_v5, %v214_v7  ;;  %v312_v5 = vperm.slane %v743_v52, 4 }
 0x36f   :  { %v216_v9 = vadd.f32 %v215_v8, %v210_v4  ;;  %v283_v4 = vperm.slane %v629_v13, 6 }
 0x371   :  { %219 = vrot.lane.b32.xlu2 %v216_v9, %s581_s21  ;;  %217 = vrot.lane.b32.xlu1 %v216_v9, %s582_s22 }
 0x3cb   :  { %v220_v10 = vpop.permute.xlu2 %219 }
 0x3e3   :  { %v218_v11 = vpop.permute.xlu1 %217 }
 0x3e4   :  { %v221_v12 = vsel %vm77_vm7, %v218_v11, %v220_v10 }
 0x3e5   :  { %v222_v14 = vadd.f32 %v221_v12, %v216_v9 }
 0x3e7   :  { %225 = vrot.lane.b32.xlu1 %v222_v14, %s583_s23  ;;  %223 = vrot.lane.b32.xlu0 %v222_v14, %s584_s24 }
 0x459   :  { %v226_v15 = vpop.permute.xlu1 %225  ;;  %v224_v17 = vpop.permute.xlu0 %223 }
 0x45a   :  { %v227_v18 = vsel %vm80_vm8, %v224_v17, %v226_v15 }
 0x45b   :  { %v228_v19 = vadd.f32 %v227_v18, %v222_v14 }
 0x45d   :  { %231 = vrot.lane.b32.xlu0 %v228_v19, %s577_s18  ;;  %229 = vrot.lane.b32.xlu2 %v228_v19, %s585_s25 }
 0x4b7   :  { %v230_v20 = vpop.permute.xlu2 %229 }
 0x4cf   :  { %v232_v21 = vpop.permute.xlu0 %231 }
 0x4d0   :  { %v233_v22 = vsel %vm83_vm9, %v230_v20, %v232_v21 }
 0x4d1   :  { %v234_v23 = vadd.f32 %v233_v22, %v228_v19  ;;  %v299_v19 = vperm.slane %v743_v52, 1 }
 0x4d3   :  { %237 = vrot.lane.b32.xlu2 %v234_v23, %s586_s26  ;;  %235 = vrot.lane.b32.xlu1 %v234_v23, %s587_s27 }
 0x52d   :  { %v238_v24 = vpop.permute.xlu2 %237 }
 0x545   :  { %v236_v25 = vpop.permute.xlu1 %235 }
 0x546   :  { %v239_v27 = vsel %vm86_vm10, %v236_v25, %v238_v24 }
 0x547   :  { %v240_v28 = vadd.f32 %v239_v27, %v234_v23 }
 0x549   :  { %v241_v29 = vmul.f32 0.001953125, %v240_v28 }
 0x54b   :  { %v242_v31 = vadd.f32 1e-05, %v241_v29 }
 0x54d   :  { %493 = vrsqrt.f32 %v242_v31  ;;  %vm249_vm12 = vweird.f32 %v242_v31 }
 0x553   :  { %v494_v33 = vpop.eup %493 }
 0x554   :  { %v244_v34 = vmul.f32 %v494_v33, %v242_v31  ;;  %vm250_vm11 = vweird.f32 %v494_v33 }
 0x555   :  { %vm251_vm13 = vmor %vm249_vm12, %vm250_vm11 }
 0x556   :  { %v245_v35 = vmul.f32 %v494_v33, %v244_v34 }
 0x558   :  { %v246_v36 = vmul.f32 0.5, %v245_v35 }
 0x55a   :  { %v247_v37 = vsub.f32 1.5, %v246_v36 }
 0x55c   :  { %v248_v39 = vmul.f32 %v494_v33, %v247_v37 }
 0x55e   :  { %v252_v40 = vsel %vm251_vm13, %v494_v33, %v248_v39 }
 0x55f   :  { %v254_v41 = vrot.slane %v252_v40, 6 }
 0x561   :  { %v256_v42 = vmul.f32 %v254_v41, %v629_v13 }
 0x563   :  { %v257_v43 = vperm.slane %v256_v42, 2 }
 0x565   :  { %v259_v46 = vmul.f32 %v257_v43, %v201_v59  ;;  %v258_v48 = vmul.f32 %v257_v43, %v200_v58  ;;  %v307_v58 = vperm.slane %v743_v52, 3 }
 0x567   :  { %v262_v49 = vadd.f32 %v260_v45, %v259_v46  ;;  %v261_v50 = vadd.f32 %v260_v45, %v258_v48 }
 0x569   :  { %265 = vrot.lane.b32.xlu1 %v262_v49, %s579_s0  ;;  %269 = vrot.lane.b32.xlu2 %v261_v50, %s580_s1  ;;  %v279_v7 = vmul.f32 %v278_v57, %v261_v50  ;;  %v308_v8 = vmul.f32 %v307_v58, %v261_v50  ;;  %v280_v15 = vmul.f32 %v278_v57, %v262_v49 }
 0x56a   :  { %263 = vrot.lane.b32.xlu0 %v261_v50, %s579_s0  ;;  %v309_v17 = vmul.f32 %v307_v58, %v262_v49  ;;  %v295_v13 = vmul.f32 %v294_v1, %v261_v50  ;;  %v296_v35 = vmul.f32 %v294_v1, %v262_v49 }
 0x572   :  { %271 = vrot.lane.b32.xlu0 %v262_v49, %s580_s1 }
 0x5c3   :  { %v270_v61 = vpop.permute.xlu2 %269 }
 0x5c4   :  { %v273_v9 = vsel %vm633_vm1, 0.0, %v270_v61 }
 0x5c5   :  { %v284_v20 = vmul.f32 %v283_v4, %v273_v9  ;;  %v313_v21 = vmul.f32 %v312_v5, %v273_v9  ;;  %v300_v40 = vmul.f32 %v299_v19, %v273_v9 }
 0x5db   :  { %v266_v56 = vpop.permute.xlu1 %265 }
 0x5dc   :  { %v264_v59 = vpop.permute.xlu0 %263  ;;  %v268_v62 = vsel %vm625_vm0, 0.0, %v266_v56 }
 0x5dd   :  { %v267_v60 = vsel %vm625_vm0, 0.0, %v264_v59  ;;  %v277_v10 = vmul.f32 %v275_v53, %v268_v62  ;;  %v290_v11 = vmul.f32 %v288_v55, %v268_v62  ;;  %v306_v6 = vmul.f32 %v304_v54, %v268_v62 }
 0x5de   :  { %v276_v3 = vmul.f32 %v275_v53, %v267_v60  ;;  %v305_v63 = vmul.f32 %v304_v54, %v267_v60  ;;  %v289_v2 = vmul.f32 %v288_v55, %v267_v60 }
 0x5df   :  { %v282_v23 = vadd.f32 %v280_v15, %v277_v10  ;;  %v293_v24 = vadd.f32 %v291_v0, %v290_v11  ;;  %v311_v25 = vadd.f32 %v309_v17, %v306_v6 }
 0x5e0   :  { %v281_v12 = vadd.f32 %v279_v7, %v276_v3  ;;  %v310_v14 = vadd.f32 %v308_v8, %v305_v63  ;;  %v292_v18 = vadd.f32 %v291_v0, %v289_v2 }
 0x5e1   :  { %v298_v41 = vadd.f32 %v296_v35, %v293_v24 }
 0x5e2   :  { %v286_v28 = vadd.f32 %v284_v20, %v281_v12  ;;  %v315_v29 = vadd.f32 %v313_v21, %v310_v14  ;;  %v297_v34 = vadd.f32 %v295_v13, %v292_v18 }
 0x5e4   :  { %v272_v22 = vpop.permute.xlu0 %271  ;;  %v317_v42 = vrot.slane %v286_v28, 7  ;;  %v323_v43 = vrot.slane %v315_v29, 1  ;;  %v302_v48 = vadd.f32 %v300_v40, %v297_v34 }
 0x5e5   :  { %v274_v27 = vsel %vm633_vm1, 0.0, %v272_v22 }
 0x5e6   :  { %v285_v31 = vmul.f32 %v283_v4, %v274_v27  ;;  %v314_v33 = vmul.f32 %v312_v5, %v274_v27  ;;  %v301_v36 = vmul.f32 %v299_v19, %v274_v27 }
 0x5e8   :  { %v287_v37 = vadd.f32 %v285_v31, %v282_v23  ;;  %v316_v39 = vadd.f32 %v314_v33, %v311_v25  ;;  %v303_v50 = vadd.f32 %v301_v36, %v298_v41 }
 0x5ea   :  { %v318_v45 = vrot.slane %v287_v37, 7  ;;  %v324_v46 = vrot.slane %v316_v39, 1 }
 0x5ec   :  { %v319_v16 = vsel %vm143_vm3, %v317_v42, %v318_v45  ;;  %v320_v53 = vsel %vm143_vm3, %v318_v45, %v317_v42  ;;  %v325_v49 = vsel %vm150_vm5, %v323_v43, %v324_v46  ;;  %v326_v54 = vsel %vm150_vm5, %v324_v46, %v323_v43 }
 0x5ed   :  { %v321_v55 = vsel %vm69_vm2, 0.0, %v320_v53  ;;  %v328_v56 = vsel %vm72_vm4, 0.0, %v326_v54  ;;  %v330_v57 = vadd.f32 %v319_v16, %v303_v50 }
 0x5ee   :  { %v329_v58 = vadd.f32 %v321_v55, %v302_v48 }
 0x5ef   :  { %v332_v59 = vadd.f32 %v330_v57, %v328_v56 }
 0x5f0   :  { %v331_v60 = vadd.f32 %v329_v58, %v325_v49 }
 0x5f1   :  { %v334_v61 = vmax.f32 %v332_v59, 0.0 }
 0x5f2   :  { %v333_v62 = vmax.f32 %v331_v60, 0.0 }
 0x5f4   :  { %v335_v3 = vadd.f32 %v334_v61, %v333_v62 }
 0x5f6   :  { %v336_v63 = vrot.slane %v335_v3, 4 }
 0x5f8   :  { %v337_v0 = vadd.f32 %v336_v63, %v335_v3 }
 0x5fa   :  { %v338_v1 = vrot.slane %v337_v0, 2 }
 0x5fc   :  { %v339_v2 = vadd.f32 %v338_v1, %v337_v0 }
 0x5fe   :  { %v340_v4 = vrot.slane %v339_v2, 1 }
 0x600   :  { %v341_v5 = vadd.f32 %v340_v4, %v339_v2 }
 0x602   :  { %344 = vrot.lane.b32.xlu2 %v341_v5, %s579_s0  ;;  %342 = vrot.lane.b32.xlu1 %v341_v5, %s580_s1 }
 0x65c   :  { %v345_v30 = vpop.permute.xlu2 %344 }
 0x674   :  { %v343_v47 = vpop.permute.xlu1 %342 }
 0x675   :  { %v346_v7 = vsel %vm677_vm6, %v343_v47, %v345_v30 }
 0x676   :  { %v347_v8 = vadd.f32 %v346_v7, %v341_v5 }
 0x678   :  { %350 = vrot.lane.b32.xlu1 %v347_v8, %s581_s21  ;;  %348 = vrot.lane.b32.xlu0 %v347_v8, %s582_s22 }
 0x6ea   :  { %v351_v9 = vpop.permute.xlu1 %350  ;;  %v349_v10 = vpop.permute.xlu0 %348 }
 0x6eb   :  { %v352_v11 = vsel %vm77_vm7, %v349_v10, %v351_v9 }
 0x6ec   :  { %v353_v6 = vadd.f32 %v352_v11, %v347_v8 }
 0x6ee   :  { %356 = vrot.lane.b32.xlu0 %v353_v6, %s583_s23  ;;  %354 = vrot.lane.b32.xlu2 %v353_v6, %s584_s24 }
 0x748   :  { %v355_v12 = vpop.permute.xlu2 %354 }
 0x760   :  { %v357_v14 = vpop.permute.xlu0 %356 }
 0x761   :  { %v358_v15 = vsel %vm80_vm8, %v355_v12, %v357_v14 }
 0x762   :  { %v359_v17 = vadd.f32 %v358_v15, %v353_v6 }
 0x764   :  { %362 = vrot.lane.b32.xlu2 %v359_v17, %s577_s18  ;;  %360 = vrot.lane.b32.xlu1 %v359_v17, %s585_s25 }
 0x7be   :  { %v363_v18 = vpop.permute.xlu2 %362 }
 0x7d6   :  { %v361_v19 = vpop.permute.xlu1 %360 }
 0x7d7   :  { %v364_v20 = vsel %vm83_vm9, %v361_v19, %v363_v18 }
 0x7d8   :  { %v365_v21 = vadd.f32 %v364_v20, %v359_v17  ;;  %v49_v17 = vld [vmem:[#allocation5 + $0x18] sm:$0x3] }
 0x7d9   :  { %v449_v18 = vperm.slane %v49_v17, 0  ;;  %v452_v20 = vperm.slane %v49_v17, 1 }
 0x7da   :  { %368 = vrot.lane.b32.xlu1 %v365_v21, %s586_s26  ;;  %366 = vrot.lane.b32.xlu0 %v365_v21, %s587_s27 }
 0x84c   :  { %v369_v13 = vpop.permute.xlu1 %368  ;;  %v367_v22 = vpop.permute.xlu0 %366 }
 0x84d   :  { %v370_v23 = vsel %vm86_vm10, %v367_v22, %v369_v13 }
 0x84e   :  { %v371_v24 = vadd.f32 %v370_v23, %v365_v21 }
 0x850   :  { %v372_v25 = vmul.f32 0.001953125, %v371_v24 }
 0x852   :  { %v373_v27 = vperm.slane %v372_v25, 0 }
 0x854   :  { %v374_v28 = vsub.f32 %v333_v62, %v373_v27  ;;  %v375_v29 = vsub.f32 %v334_v61, %v373_v27 }
 0x856   :  { %v376_v31 = vmul.f32 %v374_v28, %v374_v28  ;;  %v377_v33 = vmul.f32 %v375_v29, %v375_v29 }
 0x858   :  { %v378_v34 = vadd.f32 %v377_v33, %v376_v31 }
 0x85a   :  { %v379_v35 = vrot.slane %v378_v34, 4 }
 0x85c   :  { %v380_v36 = vadd.f32 %v379_v35, %v378_v34 }
 0x85e   :  { %v381_v37 = vrot.slane %v380_v36, 2 }
 0x860   :  { %v382_v39 = vadd.f32 %v381_v37, %v380_v36 }
 0x862   :  { %v383_v40 = vrot.slane %v382_v39, 1 }
 0x864   :  { %v384_v41 = vadd.f32 %v383_v40, %v382_v39 }
 0x866   :  { %387 = vrot.lane.b32.xlu0 %v384_v41, %s579_s0  ;;  %385 = vrot.lane.b32.xlu2 %v384_v41, %s580_s1 }
 0x8c0   :  { %v386_v42 = vpop.permute.xlu2 %385 }
 0x8d8   :  { %v388_v43 = vpop.permute.xlu0 %387 }
 0x8d9   :  { %v389_v45 = vsel %vm677_vm6, %v386_v42, %v388_v43 }
 0x8da   :  { %v390_v46 = vadd.f32 %v389_v45, %v384_v41 }
 0x8dc   :  { %393 = vrot.lane.b32.xlu2 %v390_v46, %s581_s21  ;;  %391 = vrot.lane.b32.xlu1 %v390_v46, %s582_s22 }
 0x936   :  { %v394_v48 = vpop.permute.xlu2 %393 }
 0x94e   :  { %v392_v50 = vpop.permute.xlu1 %391 }
 0x94f   :  { %v395_v16 = vsel %vm77_vm7, %v392_v50, %v394_v48 }
 0x950   :  { %v396_v53 = vadd.f32 %v395_v16, %v390_v46 }
 0x952   :  { %399 = vrot.lane.b32.xlu1 %v396_v53, %s583_s23  ;;  %397 = vrot.lane.b32.xlu0 %v396_v53, %s584_s24 }
 0x9c4   :  { %v400_v49 = vpop.permute.xlu1 %399  ;;  %v398_v54 = vpop.permute.xlu0 %397 }
 0x9c5   :  { %v401_v26 = vsel %vm80_vm8, %v398_v54, %v400_v49 }
 0x9c6   :  { %v402_v55 = vadd.f32 %v401_v26, %v396_v53 }
 0x9c8   :  { %405 = vrot.lane.b32.xlu0 %v402_v55, %s577_s18  ;;  %403 = vrot.lane.b32.xlu2 %v402_v55, %s585_s25 }
 0xa22   :  { %v404_v56 = vpop.permute.xlu2 %403 }
 0xa3a   :  { %v406_v57 = vpop.permute.xlu0 %405 }
 0xa3b   :  { %v407_v32 = vsel %vm83_vm9, %v404_v56, %v406_v57 }
 0xa3c   :  { %v408_v58 = vadd.f32 %v407_v32, %v402_v55 }
 0xa3e   :  { %411 = vrot.lane.b32.xlu2 %v408_v58, %s586_s26  ;;  %409 = vrot.lane.b32.xlu1 %v408_v58, %s587_s27 }
 0xa98   :  { %v412_v59 = vpop.permute.xlu2 %411 }
 0xab0   :  { %v410_v60 = vpop.permute.xlu1 %409 }
 0xab1   :  { %v413_v38 = vsel %vm86_vm10, %v410_v60, %v412_v59 }
 0xab2   :  { %v414_v61 = vadd.f32 %v413_v38, %v408_v58 }
 0xab4   :  { %v415_v62 = vmul.f32 0.001953125, %v414_v61 }
 0xab6   :  { %v416_v3 = vadd.f32 1e-05, %v415_v62 }
 0xab8   :  { %495 = vrsqrt.f32 %v416_v3  ;;  %vm423_vm15 = vweird.f32 %v416_v3 }
 0xabe   :  { %v496_v63 = vpop.eup %495 }
 0xabf   :  { %v418_v0 = vmul.f32 %v496_v63, %v416_v3  ;;  %vm424_vm14 = vweird.f32 %v496_v63 }
 0xac0   :  { %vm425_vm0 = vmor %vm423_vm15, %vm424_vm14 }
 0xac1   :  { %v419_v1 = vmul.f32 %v496_v63, %v418_v0 }
 0xac3   :  { %v420_v2 = vmul.f32 0.5, %v419_v1 }
 0xac5   :  { %v421_v44 = vsub.f32 1.5, %v420_v2 }
 0xac7   :  { %v422_v4 = vmul.f32 %v496_v63, %v421_v44 }
 0xac9   :  { %v426_v5 = vsel %vm425_vm0, %v496_v63, %v422_v4 }
 0xaca   :  { %v428_v30 = vrot.slane %v426_v5, 2 }
 0xacc   :  { %v430_v47 = vmul.f32 %v428_v30, %v743_v52 }
 0xace   :  { %v431_v7 = vperm.slane %v430_v47, 6 }
 0xad0   :  { %v433_v8 = vmul.f32 %v431_v7, %v375_v29  ;;  %v432_v9 = vmul.f32 %v431_v7, %v374_v28 }
 0xad2   :  { %v436_v10 = vadd.f32 %v434_v51, %v433_v8  ;;  %v435_v11 = vadd.f32 %v434_v51, %v432_v9 }
 0xad4   :  { %439 = vrot.lane.b32.xlu1 %v436_v10, %s588_s28  ;;  %437 = vrot.lane.b32.xlu0 %v435_v11, %s588_s28 }
 0xb46   :  { %v440_v6 = vpop.permute.xlu1 %439  ;;  %v438_v12 = vpop.permute.xlu0 %437 }
 0xb47   :  { %v442_v14 = vmax.f32 %v436_v10, %v440_v6  ;;  %v441_v15 = vmax.f32 %v435_v11, %v438_v12 }
 0xb49   :  { %445 = vrot.lane.b32.xlu0 %v442_v14, %s589_s29  ;;  %443 = vrot.lane.b32.xlu2 %v441_v15, %s589_s29 }
 0xba3   :  { %v444_v19 = vpop.permute.xlu2 %443 }
 0xba4   :  { %v447_v21 = vmax.f32 %v441_v15, %v444_v19 }
 0xba6   :  { %v450_v52 = vmul.f32 %v449_v18, %v447_v21 }
 0xba8   :  { %v453_v13 = vadd.f32 %v452_v20, %v450_v52 }
 0xbaa   :  { %455 = vst [vmem:[#allocation7] sm:$0xff] %v453_v13 }
 0xbbb   :  { %v446_v22 = vpop.permute.xlu0 %445 }
 0xbbc   :  { %v448_v23 = vmax.f32 %v442_v14, %v446_v22 }
 0xbbe   :  { %v451_v24 = vmul.f32 %v449_v18, %v448_v23 }
 0xbc0   :  { %v454_v25 = vadd.f32 %v452_v20, %v451_v24 }
 0xbc2   :  { %456 = vst [vmem:[#allocation7 + $0x8] sm:$0xff] %v454_v25 }
 0xbc3   :  { %469 = dma.vmem_to_hbm [thread:$0]  %s462_s3, 256, %s464_s6, [#allocation4], %s576_s17, %s576_s17, %s577_s18  }
 0xbc4   :  { %573 = dma.done.wait [#allocation4], 256  }
 0xbc5   :  { %574 = vsyncadd [#allocation4], 4294967040 }
 0xbc6   :  { %474 = vsyncpa [#allocation3], 1 }
 0xbc7   :  { %475 = vsyncpa [#allocation6], 1 }
 0xbc8   :  { %476 = vsyncpa [#allocation4], 1 }

</bundles_post_ra>
